<compile_context>
chip_gen: v5e
topology: v5e:2x2
jax: 0.10.0
libtpu: 0.0.40
codegen_flags: <defaults>
</compile_context>

<pallas_src>
import functools

import jax
import jax.numpy as jnp
from jax.experimental import pallas as pl
from jax.experimental.pallas import tpu as pltpu


def _round_up(n, m):
    return ((n + m - 1) // m) * m


def _cdiv(a, b):
    return -(-a // b)


def _pad_axis(x, axis, target):
    pad = target - x.shape[axis]
    if pad <= 0:
        return x
    widths = [(0, 0)] * x.ndim
    widths[axis] = (0, pad)
    return jnp.pad(x, widths)


def _cmc_kernel(x_ref, w1_ref, b1_ref, w2_ref, b2_ref, w3_ref, b3_ref,
                mu_pv_ref, mu_j_ref, *, n_views, inv_views):
    """One batch tile: run all V per-view encoders (static loop), average for mu_J."""
    acc = jnp.zeros(mu_j_ref.shape, jnp.float32)
    for v in range(n_views):  # static unroll; weights for every view are VMEM-resident
        x = x_ref[v]                                                     # (TB, Dp)
        h1 = jnp.dot(x, w1_ref[v], preferred_element_type=jnp.float32) + b1_ref[v]
        h1 = jnp.maximum(h1, 0.0)                                        # ReLU in f32
        h2 = jnp.dot(h1.astype(w2_ref.dtype), w2_ref[v],
                     preferred_element_type=jnp.float32) + b2_ref[v]
        h2 = jnp.maximum(h2, 0.0)
        mu = jnp.dot(h2.astype(w3_ref.dtype), w3_ref[v],
                     preferred_element_type=jnp.float32) + b3_ref[v]     # (TB, Lp) f32
        mu_pv_ref[v] = mu.astype(mu_pv_ref.dtype)
        acc = acc + mu
    mu_j_ref[...] = (acc * inv_views).astype(mu_j_ref.dtype)


def cmc_forward(views, params, *, use_bf16=True, batch_tile=512):
    """views: f32[V, B, D]; returns (mu_J f32[B, L], mu_perview f32[V, B, L])."""
    V, B, D = views.shape
    H = params["w1"].shape[-1]
    L = params["w3"].shape[-1]

    mat_dtype = jnp.bfloat16 if use_bf16 else jnp.float32
    wsz = jnp.dtype(mat_dtype).itemsize
    sub = 16 if use_bf16 else 8  # sublane alignment for the batch-tile dim

    # D is a contracted dim: pad only to the sublane multiple (not 128) to avoid
    # inflating x traffic for skinny views.  H / L feed lane-dense matmuls & stores.
    Dp = _round_up(D, sub)
    Hp = _round_up(H, 128)
    Lp = _round_up(L, 128)

    # --- batch tiling: divisor-aware so Bp never overshoots B by a whole tile ----
    tb_target = max(sub, _round_up(min(B, batch_tile), sub))
    num_bt = _cdiv(B, tb_target)
    TB = _round_up(_cdiv(B, num_bt), sub)

    # --- VMEM budget: double-buffered ins/outs + f32 temporaries, cap for v7x ----
    def footprint(tb):
        x_b = V * tb * Dp * wsz
        w_b = V * (Dp * Hp + Hp * Hp + Hp * Lp) * wsz
        bias_b = V * (2 * Hp + Lp) * 4
        mu_pv_b = V * tb * Lp * 4
        mu_j_b = tb * Lp * 4
        pipelined = 2 * (x_b + w_b + bias_b + mu_pv_b + mu_j_b)   # double-buffered
        temps = tb * (2 * Hp + 2 * Lp) * 4                        # h1/h2/mu/acc (f32)
        return pipelined + temps

    VMEM_CAP = 56 << 20  # leave headroom inside v7x's 64 MiB physical VMEM per TC
    HEADROOM = 4 << 20
    while TB > sub and footprint(TB) + HEADROOM > VMEM_CAP:
        TB = _round_up(max(TB // 2, sub), sub)
    num_bt = _cdiv(B, TB)
    Bp = num_bt * TB
    vmem_limit = int(min(max(footprint(TB) + HEADROOM, 16 << 20), VMEM_CAP))

    # --- pad & cast operands (zero padding is exact for this MLP) ----------------
    x = _pad_axis(_pad_axis(views, 2, Dp), 1, Bp).astype(mat_dtype)
    w1 = _pad_axis(_pad_axis(params["w1"], 1, Dp), 2, Hp).astype(mat_dtype)
    w2 = _pad_axis(_pad_axis(params["w2"], 1, Hp), 2, Hp).astype(mat_dtype)
    w3 = _pad_axis(_pad_axis(params["w3"], 1, Hp), 2, Lp).astype(mat_dtype)
    b1 = _pad_axis(params["b1"], 2, Hp).astype(jnp.float32)
    b2 = _pad_axis(params["b2"], 2, Hp).astype(jnp.float32)
    b3 = _pad_axis(params["b3"], 2, Lp).astype(jnp.float32)

    # Weights / biases use a constant index_map -> fetched once, resident across the
    # whole (batch-tile) grid.  Only x / mu_perview / mu_J blocks move per step.
    grid_spec = pltpu.PrefetchScalarGridSpec(
        num_scalar_prefetch=0,
        grid=(num_bt,),
        in_specs=[
            pl.BlockSpec((V, TB, Dp), lambda tb: (0, tb, 0)),   # x
            pl.BlockSpec((V, Dp, Hp), lambda tb: (0, 0, 0)),    # W1 (resident)
            pl.BlockSpec((V, 1, Hp), lambda tb: (0, 0, 0)),     # b1 (resident)
            pl.BlockSpec((V, Hp, Hp), lambda tb: (0, 0, 0)),    # W2 (resident)
            pl.BlockSpec((V, 1, Hp), lambda tb: (0, 0, 0)),     # b2 (resident)
            pl.BlockSpec((V, Hp, Lp), lambda tb: (0, 0, 0)),    # W3 (resident)
            pl.BlockSpec((V, 1, Lp), lambda tb: (0, 0, 0)),     # b3 (resident)
        ],
        out_specs=[
            pl.BlockSpec((V, TB, Lp), lambda tb: (0, tb, 0)),   # mu_perview
            pl.BlockSpec((TB, Lp), lambda tb: (tb, 0)),         # mu_J
        ],
    )

    mu_pv, mu_j = pl.pallas_call(
        functools.partial(_cmc_kernel, n_views=V, inv_views=1.0 / float(V)),
        out_shape=(
            jax.ShapeDtypeStruct((V, Bp, Lp), jnp.float32),
            jax.ShapeDtypeStruct((Bp, Lp), jnp.float32),
        ),
        grid_spec=grid_spec,
        compiler_params=pltpu.CompilerParams(
            # Single batch-tile axis, fully independent -> parallel (v7x megacore).
            dimension_semantics=("parallel",),
            vmem_limit_bytes=vmem_limit,
        ),
    )(x, w1, b1, w2, b2, w3, b3)

    return mu_j[:B, :L], mu_pv[:, :B, :L]


def _init_params(key, n_views, view_size, hidden_size, n_latents):
    """Deterministic PyTorch-Linear-style init: U(-1/sqrt(fan_in), 1/sqrt(fan_in))."""
    ks = jax.random.split(key, 6)

    def u(k, shape, fan_in):
        lim = 1.0 / jnp.sqrt(jnp.float32(fan_in))
        return jax.random.uniform(k, shape, jnp.float32, -lim, lim)

    return {
        "w1": u(ks[0], (n_views, view_size, hidden_size), view_size),
        "b1": u(ks[1], (n_views, 1, hidden_size), view_size),
        "w2": u(ks[2], (n_views, hidden_size, hidden_size), hidden_size),
        "b2": u(ks[3], (n_views, 1, hidden_size), hidden_size),
        "w3": u(ks[4], (n_views, hidden_size, n_latents), hidden_size),
        "b3": u(ks[5], (n_views, 1, n_latents), hidden_size),
    }


def _reference_forward(views, params):
    def enc(v):
        h1 = jax.nn.relu(views[v] @ params["w1"][v] + params["b1"][v])
        h2 = jax.nn.relu(h1 @ params["w2"][v] + params["b2"][v])
        return h2 @ params["w3"][v] + params["b3"][v]

    mus = [enc(v) for v in range(views.shape[0])]
    mu_pv = jnp.stack(mus, axis=0)
    mu_j = jnp.mean(mu_pv, axis=0)
    return mu_j, mu_pv


if __name__ == "__main__":
    # Small config consistent with the module: 3 views, view_size=16,
    # hidden_size=32, n_latents=8, batch=8.
    V, B, D, H, L = 3, 8, 16, 32, 8

    key = jax.random.PRNGKey(0)
    k_views, k_params = jax.random.split(key)
    views = jax.random.normal(k_views, (V, B, D), jnp.float32)
    params = _init_params(k_params, V, D, H, L)

    mu_j, mu_pv = cmc_forward(views, params, use_bf16=True)
    mu_j = jax.block_until_ready(mu_j)
    mu_pv = jax.block_until_ready(mu_pv)

    mu_j_ref, mu_pv_ref = _reference_forward(views, params)
    # bf16 matmul operands (f32 accumulate) vs. the pure-f32 reference.
    assert jnp.allclose(mu_j, mu_j_ref, atol=3e-2, rtol=3e-2)
    assert jnp.allclose(mu_pv, mu_pv_ref, atol=3e-2, rtol=3e-2)

    # f32 path is exact against the reference.
    mu_j32, mu_pv32 = cmc_forward(views, params, use_bf16=False)
    assert jnp.allclose(jax.block_until_ready(mu_j32), mu_j_ref, atol=1e-5, rtol=1e-5)
    assert jnp.allclose(jax.block_until_ready(mu_pv32), mu_pv_ref, atol=1e-5, rtol=1e-5)

    # TODO(synk): compute_loss (pairwise NCE via the per-view nn.Linear projections +
    # CrossEntropyLoss) is not part of forward() and is not implemented here.
    print("KERNEL_OK")
</pallas_src>

<mosaic_0001>
module attributes {stable_mosaic.version = 11 : i64} {
  func.func @_cmc_kernel(%arg0: i32, %arg1: memref<3x16x16xbf16, #tpu.memory_space<vmem>>, %arg2: memref<3x16x128xbf16, #tpu.memory_space<vmem>>, %arg3: memref<3x1x128xf32, #tpu.memory_space<vmem>>, %arg4: memref<3x128x128xbf16, #tpu.memory_space<vmem>>, %arg5: memref<3x1x128xf32, #tpu.memory_space<vmem>>, %arg6: memref<3x128x128xbf16, #tpu.memory_space<vmem>>, %arg7: memref<3x1x128xf32, #tpu.memory_space<vmem>>, %arg8: memref<3x16x128xf32, #tpu.memory_space<vmem>>, %arg9: memref<16x128xf32, #tpu.memory_space<vmem>>) attributes {dimension_semantics = [#tpu.dimension_semantics<parallel>], iteration_bounds = array<i64: 1>, scalar_prefetch = 0 : i64, scratch_operands = 0 : i64, tpu.core_type = #tpu.core_type<tc>, window_params = [{transform_indices = @transform_0, window_bounds = array<i64: 3, 16, 16>}, {pipeline_mode = #tpu.pipeline_mode<synchronous>, transform_indices = @transform_1, window_bounds = array<i64: 3, 16, 128>}, {pipeline_mode = #tpu.pipeline_mode<synchronous>, transform_indices = @transform_2, window_bounds = array<i64: 3, 1, 128>}, {pipeline_mode = #tpu.pipeline_mode<synchronous>, transform_indices = @transform_3, window_bounds = array<i64: 3, 128, 128>}, {pipeline_mode = #tpu.pipeline_mode<synchronous>, transform_indices = @transform_4, window_bounds = array<i64: 3, 1, 128>}, {pipeline_mode = #tpu.pipeline_mode<synchronous>, transform_indices = @transform_5, window_bounds = array<i64: 3, 128, 128>}, {pipeline_mode = #tpu.pipeline_mode<synchronous>, transform_indices = @transform_6, window_bounds = array<i64: 3, 1, 128>}, {transform_indices = @transform_7, window_bounds = array<i64: 3, 16, 128>}, {transform_indices = @transform_8, window_bounds = array<i64: 16, 128>}]} {
    %cst = arith.constant 0.000000e+00 : f32
    %0 = vector.broadcast %cst : f32 to vector<16x128xf32>
    %c0 = arith.constant 0 : index
    %c0_0 = arith.constant 0 : index
    %c0_1 = arith.constant 0 : index
    %1 = vector.load %arg1[%c0, %c0_0, %c0_1] : memref<3x16x16xbf16, #tpu.memory_space<vmem>>, vector<1x16x16xbf16>
    %2 = vector.shape_cast %1 : vector<1x16x16xbf16> to vector<16x16xbf16>
    %c0_2 = arith.constant 0 : index
    %c0_3 = arith.constant 0 : index
    %c0_4 = arith.constant 0 : index
    %3 = vector.load %arg2[%c0_2, %c0_3, %c0_4] : memref<3x16x128xbf16, #tpu.memory_space<vmem>>, vector<1x16x128xbf16>
    %4 = vector.shape_cast %3 : vector<1x16x128xbf16> to vector<16x128xbf16>
    %cst_5 = arith.constant dense<0.000000e+00> : vector<16x128xf32>
    %5 = tpu.matmul %2, %4, %cst_5 {dimension_numbers = #tpu.dot_dimension_numbers<[1], [0], [0], [1], [0, 0, 1, 1], [], []>} : vector<16x16xbf16>, vector<16x128xbf16>, vector<16x128xf32> -> vector<16x128xf32>
    %c0_6 = arith.constant 0 : index
    %c0_7 = arith.constant 0 : index
    %c0_8 = arith.constant 0 : index
    %6 = vector.load %arg3[%c0_6, %c0_7, %c0_8] : memref<3x1x128xf32, #tpu.memory_space<vmem>>, vector<1x1x128xf32>
    %7 = vector.shape_cast %6 : vector<1x1x128xf32> to vector<1x128xf32>
    %8 = vector.broadcast %7 : vector<1x128xf32> to vector<16x128xf32>
    %9 = arith.addf %5, %8 : vector<16x128xf32>
    %cst_9 = arith.constant 0.000000e+00 : f32
    %10 = vector.broadcast %cst_9 : f32 to vector<16x128xf32>
    %11 = arith.maximumf %9, %10 : vector<16x128xf32>
    %12 = arith.truncf %11 : vector<16x128xf32> to vector<16x128xbf16>
    %c0_10 = arith.constant 0 : index
    %c0_11 = arith.constant 0 : index
    %c0_12 = arith.constant 0 : index
    %13 = vector.load %arg4[%c0_10, %c0_11, %c0_12] : memref<3x128x128xbf16, #tpu.memory_space<vmem>>, vector<1x128x128xbf16>
    %14 = vector.shape_cast %13 : vector<1x128x128xbf16> to vector<128x128xbf16>
    %cst_13 = arith.constant dense<0.000000e+00> : vector<16x128xf32>
    %15 = tpu.matmul %12, %14, %cst_13 {dimension_numbers = #tpu.dot_dimension_numbers<[1], [0], [0], [1], [0, 0, 1, 1], [], []>} : vector<16x128xbf16>, vector<128x128xbf16>, vector<16x128xf32> -> vector<16x128xf32>
    %c0_14 = arith.constant 0 : index
    %c0_15 = arith.constant 0 : index
    %c0_16 = arith.constant 0 : index
    %16 = vector.load %arg5[%c0_14, %c0_15, %c0_16] : memref<3x1x128xf32, #tpu.memory_space<vmem>>, vector<1x1x128xf32>
    %17 = vector.shape_cast %16 : vector<1x1x128xf32> to vector<1x128xf32>
    %18 = vector.broadcast %17 : vector<1x128xf32> to vector<16x128xf32>
    %19 = arith.addf %15, %18 : vector<16x128xf32>
    %cst_17 = arith.constant 0.000000e+00 : f32
    %20 = vector.broadcast %cst_17 : f32 to vector<16x128xf32>
    %21 = arith.maximumf %19, %20 : vector<16x128xf32>
    %22 = arith.truncf %21 : vector<16x128xf32> to vector<16x128xbf16>
    %c0_18 = arith.constant 0 : index
    %c0_19 = arith.constant 0 : index
    %c0_20 = arith.constant 0 : index
    %23 = vector.load %arg6[%c0_18, %c0_19, %c0_20] : memref<3x128x128xbf16, #tpu.memory_space<vmem>>, vector<1x128x128xbf16>
    %24 = vector.shape_cast %23 : vector<1x128x128xbf16> to vector<128x128xbf16>
    %cst_21 = arith.constant dense<0.000000e+00> : vector<16x128xf32>
    %25 = tpu.matmul %22, %24, %cst_21 {dimension_numbers = #tpu.dot_dimension_numbers<[1], [0], [0], [1], [0, 0, 1, 1], [], []>} : vector<16x128xbf16>, vector<128x128xbf16>, vector<16x128xf32> -> vector<16x128xf32>
    %c0_22 = arith.constant 0 : index
    %c0_23 = arith.constant 0 : index
    %c0_24 = arith.constant 0 : index
    %26 = vector.load %arg7[%c0_22, %c0_23, %c0_24] : memref<3x1x128xf32, #tpu.memory_space<vmem>>, vector<1x1x128xf32>
    %27 = vector.shape_cast %26 : vector<1x1x128xf32> to vector<1x128xf32>
    %28 = vector.broadcast %27 : vector<1x128xf32> to vector<16x128xf32>
    %29 = arith.addf %25, %28 : vector<16x128xf32>
    %c0_25 = arith.constant 0 : index
    %c0_26 = arith.constant 0 : index
    %c0_27 = arith.constant 0 : index
    %30 = vector.load %arg8[%c0_25, %c0_26, %c0_27] : memref<3x16x128xf32, #tpu.memory_space<vmem>>, vector<1x16x128xf32>
    %31 = vector.shape_cast %30 : vector<1x16x128xf32> to vector<16x128xf32>
    %32 = vector.shape_cast %29 : vector<16x128xf32> to vector<1x16x128xf32>
    tpu.vector_store %arg8[%c0_25, %c0_26, %c0_27], %32 {strides = array<i32>} : memref<3x16x128xf32, #tpu.memory_space<vmem>>, vector<1x16x128xf32>,
    %33 = arith.addf %0, %29 : vector<16x128xf32>
    %c1 = arith.constant 1 : index
    %c0_28 = arith.constant 0 : index
    %c0_29 = arith.constant 0 : index
    %34 = vector.load %arg1[%c1, %c0_28, %c0_29] : memref<3x16x16xbf16, #tpu.memory_space<vmem>>, vector<1x16x16xbf16>
    %35 = vector.shape_cast %34 : vector<1x16x16xbf16> to vector<16x16xbf16>
    %c1_30 = arith.constant 1 : index
    %c0_31 = arith.constant 0 : index
    %c0_32 = arith.constant 0 : index
    %36 = vector.load %arg2[%c1_30, %c0_31, %c0_32] : memref<3x16x128xbf16, #tpu.memory_space<vmem>>, vector<1x16x128xbf16>
    %37 = vector.shape_cast %36 : vector<1x16x128xbf16> to vector<16x128xbf16>
    %cst_33 = arith.constant dense<0.000000e+00> : vector<16x128xf32>
    %38 = tpu.matmul %35, %37, %cst_33 {dimension_numbers = #tpu.dot_dimension_numbers<[1], [0], [0], [1], [0, 0, 1, 1], [], []>} : vector<16x16xbf16>, vector<16x128xbf16>, vector<16x128xf32> -> vector<16x128xf32>
    %c1_34 = arith.constant 1 : index
    %c0_35 = arith.constant 0 : index
    %c0_36 = arith.constant 0 : index
    %39 = vector.load %arg3[%c1_34, %c0_35, %c0_36] : memref<3x1x128xf32, #tpu.memory_space<vmem>>, vector<1x1x128xf32>
    %40 = vector.shape_cast %39 : vector<1x1x128xf32> to vector<1x128xf32>
    %41 = vector.broadcast %40 : vector<1x128xf32> to vector<16x128xf32>
    %42 = arith.addf %38, %41 : vector<16x128xf32>
    %cst_37 = arith.constant 0.000000e+00 : f32
    %43 = vector.broadcast %cst_37 : f32 to vector<16x128xf32>
    %44 = arith.maximumf %42, %43 : vector<16x128xf32>
    %45 = arith.truncf %44 : vector<16x128xf32> to vector<16x128xbf16>
    %c1_38 = arith.constant 1 : index
    %c0_39 = arith.constant 0 : index
    %c0_40 = arith.constant 0 : index
    %46 = vector.load %arg4[%c1_38, %c0_39, %c0_40] : memref<3x128x128xbf16, #tpu.memory_space<vmem>>, vector<1x128x128xbf16>
    %47 = vector.shape_cast %46 : vector<1x128x128xbf16> to vector<128x128xbf16>
    %cst_41 = arith.constant dense<0.000000e+00> : vector<16x128xf32>
    %48 = tpu.matmul %45, %47, %cst_41 {dimension_numbers = #tpu.dot_dimension_numbers<[1], [0], [0], [1], [0, 0, 1, 1], [], []>} : vector<16x128xbf16>, vector<128x128xbf16>, vector<16x128xf32> -> vector<16x128xf32>
    %c1_42 = arith.constant 1 : index
    %c0_43 = arith.constant 0 : index
    %c0_44 = arith.constant 0 : index
    %49 = vector.load %arg5[%c1_42, %c0_43, %c0_44] : memref<3x1x128xf32, #tpu.memory_space<vmem>>, vector<1x1x128xf32>
    %50 = vector.shape_cast %49 : vector<1x1x128xf32> to vector<1x128xf32>
    %51 = vector.broadcast %50 : vector<1x128xf32> to vector<16x128xf32>
    %52 = arith.addf %48, %51 : vector<16x128xf32>
    %cst_45 = arith.constant 0.000000e+00 : f32
    %53 = vector.broadcast %cst_45 : f32 to vector<16x128xf32>
    %54 = arith.maximumf %52, %53 : vector<16x128xf32>
    %55 = arith.truncf %54 : vector<16x128xf32> to vector<16x128xbf16>
    %c1_46 = arith.constant 1 : index
    %c0_47 = arith.constant 0 : index
    %c0_48 = arith.constant 0 : index
    %56 = vector.load %arg6[%c1_46, %c0_47, %c0_48] : memref<3x128x128xbf16, #tpu.memory_space<vmem>>, vector<1x128x128xbf16>
    %57 = vector.shape_cast %56 : vector<1x128x128xbf16> to vector<128x128xbf16>
    %cst_49 = arith.constant dense<0.000000e+00> : vector<16x128xf32>
    %58 = tpu.matmul %55, %57, %cst_49 {dimension_numbers = #tpu.dot_dimension_numbers<[1], [0], [0], [1], [0, 0, 1, 1], [], []>} : vector<16x128xbf16>, vector<128x128xbf16>, vector<16x128xf32> -> vector<16x128xf32>
    %c1_50 = arith.constant 1 : index
    %c0_51 = arith.constant 0 : index
    %c0_52 = arith.constant 0 : index
    %59 = vector.load %arg7[%c1_50, %c0_51, %c0_52] : memref<3x1x128xf32, #tpu.memory_space<vmem>>, vector<1x1x128xf32>
    %60 = vector.shape_cast %59 : vector<1x1x128xf32> to vector<1x128xf32>
    %61 = vector.broadcast %60 : vector<1x128xf32> to vector<16x128xf32>
    %62 = arith.addf %58, %61 : vector<16x128xf32>
    %c1_53 = arith.constant 1 : index
    %c0_54 = arith.constant 0 : index
    %c0_55 = arith.constant 0 : index
    %63 = vector.load %arg8[%c1_53, %c0_54, %c0_55] : memref<3x16x128xf32, #tpu.memory_space<vmem>>, vector<1x16x128xf32>
    %64 = vector.shape_cast %63 : vector<1x16x128xf32> to vector<16x128xf32>
    %65 = vector.shape_cast %62 : vector<16x128xf32> to vector<1x16x128xf32>
    tpu.vector_store %arg8[%c1_53, %c0_54, %c0_55], %65 {strides = array<i32>} : memref<3x16x128xf32, #tpu.memory_space<vmem>>, vector<1x16x128xf32>,
    %66 = arith.addf %33, %62 : vector<16x128xf32>
    %c2 = arith.constant 2 : index
    %c0_56 = arith.constant 0 : index
    %c0_57 = arith.constant 0 : index
    %67 = vector.load %arg1[%c2, %c0_56, %c0_57] : memref<3x16x16xbf16, #tpu.memory_space<vmem>>, vector<1x16x16xbf16>
    %68 = vector.shape_cast %67 : vector<1x16x16xbf16> to vector<16x16xbf16>
    %c2_58 = arith.constant 2 : index
    %c0_59 = arith.constant 0 : index
    %c0_60 = arith.constant 0 : index
    %69 = vector.load %arg2[%c2_58, %c0_59, %c0_60] : memref<3x16x128xbf16, #tpu.memory_space<vmem>>, vector<1x16x128xbf16>
    %70 = vector.shape_cast %69 : vector<1x16x128xbf16> to vector<16x128xbf16>
    %cst_61 = arith.constant dense<0.000000e+00> : vector<16x128xf32>
    %71 = tpu.matmul %68, %70, %cst_61 {dimension_numbers = #tpu.dot_dimension_numbers<[1], [0], [0], [1], [0, 0, 1, 1], [], []>} : vector<16x16xbf16>, vector<16x128xbf16>, vector<16x128xf32> -> vector<16x128xf32>
    %c2_62 = arith.constant 2 : index
    %c0_63 = arith.constant 0 : index
    %c0_64 = arith.constant 0 : index
    %72 = vector.load %arg3[%c2_62, %c0_63, %c0_64] : memref<3x1x128xf32, #tpu.memory_space<vmem>>, vector<1x1x128xf32>
    %73 = vector.shape_cast %72 : vector<1x1x128xf32> to vector<1x128xf32>
    %74 = vector.broadcast %73 : vector<1x128xf32> to vector<16x128xf32>
    %75 = arith.addf %71, %74 : vector<16x128xf32>
    %cst_65 = arith.constant 0.000000e+00 : f32
    %76 = vector.broadcast %cst_65 : f32 to vector<16x128xf32>
    %77 = arith.maximumf %75, %76 : vector<16x128xf32>
    %78 = arith.truncf %77 : vector<16x128xf32> to vector<16x128xbf16>
    %c2_66 = arith.constant 2 : index
    %c0_67 = arith.constant 0 : index
    %c0_68 = arith.constant 0 : index
    %79 = vector.load %arg4[%c2_66, %c0_67, %c0_68] : memref<3x128x128xbf16, #tpu.memory_space<vmem>>, vector<1x128x128xbf16>
    %80 = vector.shape_cast %79 : vector<1x128x128xbf16> to vector<128x128xbf16>
    %cst_69 = arith.constant dense<0.000000e+00> : vector<16x128xf32>
    %81 = tpu.matmul %78, %80, %cst_69 {dimension_numbers = #tpu.dot_dimension_numbers<[1], [0], [0], [1], [0, 0, 1, 1], [], []>} : vector<16x128xbf16>, vector<128x128xbf16>, vector<16x128xf32> -> vector<16x128xf32>
    %c2_70 = arith.constant 2 : index
    %c0_71 = arith.constant 0 : index
    %c0_72 = arith.constant 0 : index
    %82 = vector.load %arg5[%c2_70, %c0_71, %c0_72] : memref<3x1x128xf32, #tpu.memory_space<vmem>>, vector<1x1x128xf32>
    %83 = vector.shape_cast %82 : vector<1x1x128xf32> to vector<1x128xf32>
    %84 = vector.broadcast %83 : vector<1x128xf32> to vector<16x128xf32>
    %85 = arith.addf %81, %84 : vector<16x128xf32>
    %cst_73 = arith.constant 0.000000e+00 : f32
    %86 = vector.broadcast %cst_73 : f32 to vector<16x128xf32>
    %87 = arith.maximumf %85, %86 : vector<16x128xf32>
    %88 = arith.truncf %87 : vector<16x128xf32> to vector<16x128xbf16>
    %c2_74 = arith.constant 2 : index
    %c0_75 = arith.constant 0 : index
    %c0_76 = arith.constant 0 : index
    %89 = vector.load %arg6[%c2_74, %c0_75, %c0_76] : memref<3x128x128xbf16, #tpu.memory_space<vmem>>, vector<1x128x128xbf16>
    %90 = vector.shape_cast %89 : vector<1x128x128xbf16> to vector<128x128xbf16>
    %cst_77 = arith.constant dense<0.000000e+00> : vector<16x128xf32>
    %91 = tpu.matmul %88, %90, %cst_77 {dimension_numbers = #tpu.dot_dimension_numbers<[1], [0], [0], [1], [0, 0, 1, 1], [], []>} : vector<16x128xbf16>, vector<128x128xbf16>, vector<16x128xf32> -> vector<16x128xf32>
    %c2_78 = arith.constant 2 : index
    %c0_79 = arith.constant 0 : index
    %c0_80 = arith.constant 0 : index
    %92 = vector.load %arg7[%c2_78, %c0_79, %c0_80] : memref<3x1x128xf32, #tpu.memory_space<vmem>>, vector<1x1x128xf32>
    %93 = vector.shape_cast %92 : vector<1x1x128xf32> to vector<1x128xf32>
    %94 = vector.broadcast %93 : vector<1x128xf32> to vector<16x128xf32>
    %95 = arith.addf %91, %94 : vector<16x128xf32>
    %c2_81 = arith.constant 2 : index
    %c0_82 = arith.constant 0 : index
    %c0_83 = arith.constant 0 : index
    %96 = vector.load %arg8[%c2_81, %c0_82, %c0_83] : memref<3x16x128xf32, #tpu.memory_space<vmem>>, vector<1x16x128xf32>
    %97 = vector.shape_cast %96 : vector<1x16x128xf32> to vector<16x128xf32>
    %98 = vector.shape_cast %95 : vector<16x128xf32> to vector<1x16x128xf32>
    tpu.vector_store %arg8[%c2_81, %c0_82, %c0_83], %98 {strides = array<i32>} : memref<3x16x128xf32, #tpu.memory_space<vmem>>, vector<1x16x128xf32>,
    %99 = arith.addf %66, %95 : vector<16x128xf32>
    %cst_84 = arith.constant 0.333333343 : f32
    %100 = vector.broadcast %cst_84 : f32 to vector<16x128xf32>
    %101 = arith.mulf %99, %100 : vector<16x128xf32>
    %c0_85 = arith.constant 0 : index
    %c0_86 = arith.constant 0 : index
    %102 = vector.load %arg9[%c0_85, %c0_86] : memref<16x128xf32, #tpu.memory_space<vmem>>, vector<16x128xf32>
    tpu.vector_store %arg9[%c0_85, %c0_86], %101 {strides = array<i32>} : memref<16x128xf32, #tpu.memory_space<vmem>>, vector<16x128xf32>,
    return
  }
  func.func @transform_0(%arg0: i32) -> (i32, i32, i32) {
    %c0_i32 = arith.constant 0 : i32
    %c0_i32_0 = arith.constant 0 : i32
    %c0_i32_1 = arith.constant 0 : i32
    return %c0_i32, %arg0, %c0_i32_0 : i32, i32, i32
  }
  func.func @transform_1(%arg0: i32) -> (i32, i32, i32) {
    %c0_i32 = arith.constant 0 : i32
    %c0_i32_0 = arith.constant 0 : i32
    %c0_i32_1 = arith.constant 0 : i32
    %c0_i32_2 = arith.constant 0 : i32
    return %c0_i32, %c0_i32_0, %c0_i32_1 : i32, i32, i32
  }
  func.func @transform_2(%arg0: i32) -> (i32, i32, i32) {
    %c0_i32 = arith.constant 0 : i32
    %c0_i32_0 = arith.constant 0 : i32
    %c0_i32_1 = arith.constant 0 : i32
    %c0_i32_2 = arith.constant 0 : i32
    return %c0_i32, %c0_i32_0, %c0_i32_1 : i32, i32, i32
  }
  func.func @transform_3(%arg0: i32) -> (i32, i32, i32) {
    %c0_i32 = arith.constant 0 : i32
    %c0_i32_0 = arith.constant 0 : i32
    %c0_i32_1 = arith.constant 0 : i32
    %c0_i32_2 = arith.constant 0 : i32
    return %c0_i32, %c0_i32_0, %c0_i32_1 : i32, i32, i32
  }
  func.func @transform_4(%arg0: i32) -> (i32, i32, i32) {
    %c0_i32 = arith.constant 0 : i32
    %c0_i32_0 = arith.constant 0 : i32
    %c0_i32_1 = arith.constant 0 : i32
    %c0_i32_2 = arith.constant 0 : i32
    return %c0_i32, %c0_i32_0, %c0_i32_1 : i32, i32, i32
  }
  func.func @transform_5(%arg0: i32) -> (i32, i32, i32) {
    %c0_i32 = arith.constant 0 : i32
    %c0_i32_0 = arith.constant 0 : i32
    %c0_i32_1 = arith.constant 0 : i32
    %c0_i32_2 = arith.constant 0 : i32
    return %c0_i32, %c0_i32_0, %c0_i32_1 : i32, i32, i32
  }
  func.func @transform_6(%arg0: i32) -> (i32, i32, i32) {
    %c0_i32 = arith.constant 0 : i32
    %c0_i32_0 = arith.constant 0 : i32
    %c0_i32_1 = arith.constant 0 : i32
    %c0_i32_2 = arith.constant 0 : i32
    return %c0_i32, %c0_i32_0, %c0_i32_1 : i32, i32, i32
  }
  func.func @transform_7(%arg0: i32) -> (i32, i32, i32) {
    %c0_i32 = arith.constant 0 : i32
    %c0_i32_0 = arith.constant 0 : i32
    %c0_i32_1 = arith.constant 0 : i32
    return %c0_i32, %arg0, %c0_i32_0 : i32, i32, i32
  }
  func.func @transform_8(%arg0: i32) -> (i32, i32) {
    %c0_i32 = arith.constant 0 : i32
    %c0_i32_0 = arith.constant 0 : i32
    return %arg0, %c0_i32 : i32, i32
  }
}

</mosaic_0001>

<bundles_post_ra>
// kernel: tpu_custom_call.1
= control target key start
LH: loop header
LB: loop body
LE: loop exit
PB: predicated region body
PF: predicated region fallthrough
CT: control target
= control target key end

     0   :  { %14 = vsyncpa [#allocation3], 0  ;;  %s1425_s0 = inlined_call_operand.hbm [shape: bf16[3,16,16], index: 0, kind: input, shape index: {}]   ;;  %s1426_s1 = inlined_call_operand.hbm [shape: bf16[3,16,128], index: 1, kind: input, shape index: {}]   ;;  %s1427_s2 = inlined_call_operand.hbm [shape: f32[3,1,128], index: 2, kind: input, shape index: {}]   ;;  %s1428_s3 = inlined_call_operand.hbm [shape: bf16[3,128,128], index: 3, kind: input, shape index: {}]   ;;  %s1429_s4 = inlined_call_operand.vmem [shape: f32[3,1,128], index: 4, kind: input, shape index: {}]   ;;  %s1430_s5 = inlined_call_operand.hbm [shape: bf16[3,128,128], index: 5, kind: input, shape index: {}]   ;;  %s1431_s6 = inlined_call_operand.hbm [shape: f32[3,1,128], index: 6, kind: input, shape index: {}]   ;;  %s1432_s7 = inlined_call_operand.hbm [shape: f32[3,16,128], index: 7, kind: output, shape index: {0}]   ;;  %s1433_s8 = inlined_call_operand.hbm [shape: f32[16,128], index: 8, kind: output, shape index: {1}]  }
   0x1   :  { %15 = vsyncpa [#allocation6], 0 }
   0x2   :  { %16 = vsyncpa [#allocation9], 0 }
   0x3   :  { %17 = vsyncpa [#allocation12], 0 }
   0x4   :  { %18 = vsyncpa [#allocation4], 0 }
   0x5   :  { %19 = vsyncpa [#allocation15], 0  ;;  %s37_s29 = sshll.u32 %s1426_s1, 4  ;;  %s1318_s30 = smov [#allocation5]   ;;  %s38_s29 = int_to_ptr.hbm [resolvable:$true] %s37_s29 }
   0x6   :  { %s39_s9 = sshll.u32 %s1318_s30, 4  ;;  %s63_s12 = sshll.u32 %s1428_s3, 4  ;;  %s40_s9 = int_to_ptr.vmem [resolvable:$true] %s39_s9  ;;  %s64_s12 = int_to_ptr.hbm [resolvable:$true] %s63_s12 }
   0x7   :  { %s1319_s13 = smov 64   ;;  %s1320_s14 = smov 4  }
   0x8   :  { %45 = dma.hbm_to_vmem [thread:$0]  %s38_s29, 384, %s40_s9, [#allocation6], %s1319_s13, %s1319_s13, %s1320_s14  }
   0x9   :  { %s1321_s15 = smov [#allocation8]   ;;  %s24_s1 = sshll.u32 %s1425_s0, 4  ;;  %s25_s1 = int_to_ptr.hbm [resolvable:$true] %s24_s1 }
   0xa   :  { %s65_s16 = sshll.u32 %s1321_s15, 4  ;;  %s50_s20 = sshll.u32 %s1427_s2, 4  ;;  %s66_s16 = int_to_ptr.vmem [resolvable:$true] %s65_s16  ;;  %s51_s20 = int_to_ptr.hbm [resolvable:$true] %s50_s20 }
   0xb   :  { %71 = dma.hbm_to_vmem [thread:$0]  %s64_s12, 3072, %s66_s16, [#allocation9], %s1319_s13, %s1319_s13, %s1320_s14  }
   0xc   :  { %s1322_s21 = smov [#allocation2]   ;;  %s1323_s23 = smov [#allocation7]  }
   0xd   :  { %s26_s22 = sshll.u32 %s1322_s21, 4  ;;  %s52_s0 = sshll.u32 %s1323_s23, 4  ;;  %s27_s22 = int_to_ptr.vmem [resolvable:$true] %s26_s22  ;;  %s53_s0 = int_to_ptr.vmem [resolvable:$true] %s52_s0 }
   0xe   :  { %32 = dma.hbm_to_vmem [thread:$0]  %s25_s1, 384, %s27_s22, [#allocation3], %s1319_s13, %s1319_s13, %s1320_s14  }
   0xf   :  { %s1324_s24 = smov 16   ;;  %s1325_s25 = smov 1  }
  0x10   :  { %58 = dma.hbm_to_vmem [thread:$0]  %s51_s20, 48, %s53_s0, [#allocation6], %s1324_s24, %s1324_s24, %s1325_s25  }
  0x11   :  { %s78_s28 = sshll.u32 %s1430_s5, 4  ;;  %s1326_s2 = smov [#allocation10]   ;;  %s79_s28 = int_to_ptr.hbm [resolvable:$true] %s78_s28 }
  0x12   :  { %s80_s29 = sshll.u32 %s1326_s2, 4  ;;  %s91_s10 = sshll.u32 %s1431_s6, 4  ;;  %s81_s29 = int_to_ptr.vmem [resolvable:$true] %s80_s29  ;;  %s92_s10 = int_to_ptr.hbm [resolvable:$true] %s91_s10 }
  0x13   :  { %86 = dma.hbm_to_vmem [thread:$0]  %s79_s28, 3072, %s81_s29, [#allocation9], %s1319_s13, %s1319_s13, %s1320_s14  }
  0x14   :  { %s1327_s11 = smov [#allocation11]  }
  0x15   :  { %s93_s12 = sshll.u32 %s1327_s11, 4  ;;  %s94_s12 = int_to_ptr.vmem [resolvable:$true] %s93_s12 }
  0x16   :  { %99 = dma.hbm_to_vmem [thread:$0]  %s92_s10, 48, %s94_s12, [#allocation12], %s1324_s24, %s1324_s24, %s1325_s25  }
  0x17   :  { %1306 = dma.done.wait [#allocation3], 384  }
  0x18   :  { %1307 = vsyncadd [#allocation3], 4294966912 }
  0x19   :  { %1308 = dma.done.wait [#allocation6], 432  }
  0x1a   :  { %1309 = vsyncadd [#allocation6], 4294966864 }
  0x1b   :  { %1310 = dma.done.wait [#allocation9], 6144  }
  0x1c   :  { %1311 = vsyncadd [#allocation9], 4294961152 }
  0x1d   :  { %1312 = dma.done.wait [#allocation12], 48  }
  0x1e   :  { %1313 = vsyncadd [#allocation12], 4294967248  ;;  %v1038_v0 = vld [vmem:[#allocation5] sm:$0xff]  ;;  %v1056_v1 = vld [vmem:[#allocation5 + $0x8] sm:$0xff]  ;;  %vm144_vm0 = vcmask 130048   ;;  %s1328_s17 = smov [#allocation13]  }
  0x1f   :  { %v1037_v2 = vld [vmem:[#allocation2] sm:$0xff]  ;;  %v1046_v3 = vld [vmem:[#allocation8 + $0x38] sm:$0xff]  ;;  %155 = vmatpush.bf16.msra.mxu3 %v1038_v0  ;;  %v1043_v6 = vld [vmem:[#allocation8 + $0x20] sm:$0xff]  ;;  %s780_s18 = sshll.u32 %s1328_s17, 4  ;;  %s782_s3 = sshll.u32 %s1432_s7, 4  ;;  %s781_s18 = int_to_ptr.vmem [resolvable:$true] %s780_s18  ;;  %s783_s3 = int_to_ptr.hbm [resolvable:$true] %s782_s3 }
  0x20   :  { %233 = vmatpush.bf16.msra.mxu1 %v1046_v3  ;;  %v1045_v4 = vld [vmem:[#allocation8 + $0x30] sm:$0xff]  ;;  %v1044_v5 = vld [vmem:[#allocation8 + $0x28] sm:$0xff]  ;;  %v1042_v8 = vld [vmem:[#allocation8 + $0x18] sm:$0xff]  ;;  %s1329_s19 = smov [#allocation14]   ;;  %s795_s23 = sshll.u32 %s1433_s8, 4  ;;  %s796_s23 = int_to_ptr.hbm [resolvable:$true] %s795_s23 }
  0x21   :  { %v1055_v7 = vld [vmem:[#allocation2 + $0x8] sm:$0xff]  ;;  %v1040_v12 = vld [vmem:[#allocation8 + $0x8] sm:$0xff]  ;;  %v1039_v14 = vld [vmem:[#allocation8] sm:$0xff]  ;;  %s793_s20 = sshll.u32 %s1329_s19, 4  ;;  %s1330_s0 = smov 128   ;;  %s794_s20 = int_to_ptr.vmem [resolvable:$true] %s793_s20 }
  0x22   :  { %824 = vmatmul.msk.bf16.vlgmr.msra.gmra.mxu3 %vm144_vm0, %v1037_v2  ;;  %v1064_v9 = vld [vmem:[#allocation8 + $0x78] sm:$0xff]  ;;  %v1041_v10 = vld [vmem:[#allocation8 + $0x10] sm:$0xff]  ;;  %v1062_v13 = vld [vmem:[#allocation8 + $0x68] sm:$0xff]  ;;  %s1331_s24 = smov 8  }
  0x23   :  { %368 = vmatpush.bf16.msrb.mxu3 %v1056_v1  ;;  %448 = vmatpush.bf16.msra.mxu0 %v1064_v9  ;;  %v1063_v11 = vld [vmem:[#allocation8 + $0x70] sm:$0xff]  ;;  %v1061_v15 = vld [vmem:[#allocation8 + $0x60] sm:$0xff]  ;;  %v1060_v16 = vld [vmem:[#allocation8 + $0x58] sm:$0xff] }
  0x24   :  { %234 = vmatpush.bf16.msra.mxu1 %v1045_v4  ;;  %v1074_v17 = vld [vmem:[#allocation5 + $0x10] sm:$0xff]  ;;  %v1058_v19 = vld [vmem:[#allocation8 + $0x48] sm:$0xff]  ;;  %v1057_v20 = vld [vmem:[#allocation8 + $0x40] sm:$0xff] }
  0x25   :  { %v1059_v18 = vld [vmem:[#allocation8 + $0x50] sm:$0xff]  ;;  %v1054_v21 = vld [vmem:[#allocation10 + $0x38] sm:$0xff]  ;;  %v1052_v25 = vld [vmem:[#allocation10 + $0x28] sm:$0xff] }
  0x26   :  { %318 = vmatpush.bf16.msra.mxu2 %v1054_v21  ;;  %v1053_v23 = vld [vmem:[#allocation10 + $0x30] sm:$0xff]  ;;  %v1105_v24 = vld [vmem:[#allocation7] ss:$0 sm:$0xff]  ;;  %v1051_v29 = vld [vmem:[#allocation10 + $0x20] sm:$0xff] }
  0x27   :  { %449 = vmatpush.bf16.msra.mxu0 %v1063_v11  ;;  %v1050_v33 = vld [vmem:[#allocation10 + $0x18] sm:$0xff]  ;;  %v1049_v36 = vld [vmem:[#allocation10 + $0x10] sm:$0xff]  ;;  %v1048_v38 = vld [vmem:[#allocation10 + $0x8] sm:$0xff] }
  0x28   :  { %235 = vmatpush.bf16.msra.mxu1 %v1044_v5  ;;  %v1106_v35 = vld [vmem:[#allocation7 + $0x1] ss:$0 sm:$0xff]  ;;  %v1047_v42 = vld [vmem:[#allocation10] sm:$0xff]  ;;  %v1071_v48 = vld [vmem:[#allocation10 + $0x70] sm:$0xff] }
  0x29   :  { %v1073_v44 = vld [vmem:[#allocation2 + $0x10] sm:$0xff]  ;;  %v1081_v49 = vld [vmem:[#allocation8 + $0xb0] sm:$0xff]  ;;  %v1070_v50 = vld [vmem:[#allocation10 + $0x68] sm:$0xff] }
  0x2a   :  { %319 = vmatpush.bf16.msra.mxu2 %v1053_v23  ;;  %v1072_v46 = vld [vmem:[#allocation10 + $0x78] sm:$0xff]  ;;  %v1080_v51 = vld [vmem:[#allocation8 + $0xa8] sm:$0xff]  ;;  %v1069_v52 = vld [vmem:[#allocation10 + $0x60] sm:$0xff] }
  0x2b   :  { %450 = vmatpush.bf16.msra.mxu0 %v1062_v13  ;;  %v1082_v47 = vld [vmem:[#allocation8 + $0xb8] sm:$0xff]  ;;  %535 = vmatpush.bf16.msra.mxu3 %v1072_v46  ;;  %v1079_v53 = vld [vmem:[#allocation8 + $0xa0] sm:$0xff]  ;;  %v1067_v56 = vld [vmem:[#allocation10 + $0x50] sm:$0xff] }
  0x2c   :  { %236 = vmatpush.bf16.msra.mxu1 %v1043_v6  ;;  %v1068_v54 = vld [vmem:[#allocation10 + $0x58] sm:$0xff]  ;;  %v1077_v57 = vld [vmem:[#allocation8 + $0x90] sm:$0xff]  ;;  %v1066_v58 = vld [vmem:[#allocation10 + $0x48] sm:$0xff] }
  0x2d   :  { %v1078_v55 = vld [vmem:[#allocation8 + $0x98] sm:$0xff]  ;;  %v1076_v59 = vld [vmem:[#allocation8 + $0x88] sm:$0xff]  ;;  %v1065_v60 = vld [vmem:[#allocation10 + $0x40] sm:$0xff] }
  0x2e   :  { %320 = vmatpush.bf16.msra.mxu2 %v1052_v25  ;;  %v1075_v61 = vld [vmem:[#allocation8 + $0x80] sm:$0xff]  ;;  %v1107_v63 = vld [vmem:[%s1429_s4] ss:$0 sm:$0xff]  ;;  %v1109_v9 = vld [vmem:[#allocation7 + $0x2] ss:$0 sm:$0xff] }
  0x2f   :  { %451 = vmatpush.bf16.msra.mxu0 %v1061_v15  ;;  %536 = vmatpush.bf16.msra.mxu3 %v1071_v48  ;;  %v1089_v23 = vld [vmem:[#allocation10 + $0xb0] sm:$0xff]  ;;  %v1087_v25 = vld [vmem:[#allocation10 + $0xa0] sm:$0xff] }
  0x30   :  { %237 = vmatpush.bf16.msra.mxu1 %v1042_v8  ;;  %v1108_v8 = vld [vmem:[%s1429_s4 + $0x1] ss:$0 sm:$0xff] }
  0x32   :  { %897 = vmatmul.msk.bf16.vlgmr.msrb.gmra.mxu3 %vm144_vm0, %v1055_v7  ;;  %321 = vmatpush.bf16.msra.mxu2 %v1051_v29  ;;  %v1083_v29 = vld [vmem:[#allocation10 + $0x80] sm:$0xff] }
  0x33   :  { %452 = vmatpush.bf16.msra.mxu0 %v1060_v16  ;;  %537 = vmatpush.bf16.msra.mxu3 %v1070_v50  ;;  %v1113_v50 = vld [vmem:[#allocation11 + $0x2] ss:$0 sm:$0xff] }
  0x34   :  { %238 = vmatpush.bf16.msra.mxu1 %v1041_v10 }
  0x36   :  { %322 = vmatpush.bf16.msra.mxu2 %v1050_v33 }
  0x37   :  { %453 = vmatpush.bf16.msra.mxu0 %v1059_v18  ;;  %538 = vmatpush.bf16.msra.mxu3 %v1069_v52 }
  0x38   :  { %239 = vmatpush.bf16.msra.mxu1 %v1040_v12 }
  0x3a   :  { %323 = vmatpush.bf16.msra.mxu2 %v1049_v36 }
  0x3b   :  { %454 = vmatpush.bf16.msra.mxu0 %v1058_v19  ;;  %539 = vmatpush.bf16.msra.mxu3 %v1068_v54 }
  0x3c   :  { %240 = vmatpush.bf16.msra.mxu1 %v1039_v14 }
  0x3e   :  { %324 = vmatpush.bf16.msra.mxu2 %v1048_v38 }
  0x3f   :  { %455 = vmatpush.bf16.msra.mxu0 %v1057_v20  ;;  %540 = vmatpush.bf16.msra.mxu3 %v1067_v56 }
  0x40   :  { %586 = vmatpush.bf16.msrb.mxu1 %v1074_v17 }
  0x42   :  { %325 = vmatpush.bf16.msra.mxu2 %v1047_v42 }
  0x43   :  { %541 = vmatpush.bf16.msra.mxu3 %v1066_v58 }
  0x46   :  { %666 = vmatpush.bf16.msrb.mxu2 %v1082_v47 }
  0x47   :  { %542 = vmatpush.bf16.msra.mxu3 %v1065_v60 }
  0x4a   :  { %667 = vmatpush.bf16.msrb.mxu2 %v1081_v49 }
  0x4e   :  { %668 = vmatpush.bf16.msrb.mxu2 %v1080_v51 }
  0x52   :  { %669 = vmatpush.bf16.msrb.mxu2 %v1079_v53 }
  0x56   :  { %670 = vmatpush.bf16.msrb.mxu2 %v1078_v55 }
  0x5a   :  { %671 = vmatpush.bf16.msrb.mxu2 %v1077_v57 }
  0x5e   :  { %672 = vmatpush.bf16.msrb.mxu2 %v1076_v59 }
  0x62   :  { %673 = vmatpush.bf16.msrb.mxu2 %v1075_v61 }
  0xa5   :  { %v157_v22 = vpop.f32.mrf.mxu3 }
  0xa6   :  { %v158_v26 = vadd.f32 %v1105_v24, %v157_v22  ;;  %v1090_v22 = vld [vmem:[#allocation10 + $0xb8] sm:$0xff] }
  0xa7   :  { %753 = vmatpush.bf16.msrb.mxu0 %v1090_v22 }
  0xa8   :  { %v162_v30 = vmax.f32 %v158_v26, 0.0  ;;  %v1086_v26 = vld [vmem:[#allocation10 + $0x98] sm:$0xff] }
  0xab   :  { %754 = vmatpush.bf16.msrb.mxu0 %v1089_v23 }
  0xad   :  { %v159_v27 = vpop.f32.mrf.mxu3 }
  0xae   :  { %v160_v28 = vadd.f32 %v1105_v24, %v159_v27  ;;  %v1088_v24 = vld [vmem:[#allocation10 + $0xa8] sm:$0xff]  ;;  %v1085_v27 = vld [vmem:[#allocation10 + $0x90] sm:$0xff] }
  0xaf   :  { %755 = vmatpush.bf16.msrb.mxu0 %v1088_v24 }
  0xb0   :  { %v163_v31 = vmax.f32 %v160_v28, 0.0  ;;  %v1084_v28 = vld [vmem:[#allocation10 + $0x88] sm:$0xff] }
  0xb2   :  { %v164_v32 = vpack.c.bf16 %v163_v31, %v162_v30  ;;  %v1110_v30 = vld [vmem:[#allocation11] ss:$0 sm:$0xff] }
  0xb3   :  { %756 = vmatpush.bf16.msrb.mxu0 %v1087_v25 }
  0xb4   :  { %241 = vmatmul.bf16.vlgmr.msra.gmra.mxu1 %v164_v32 }
  0xb5   :  { %v370_v34 = vpop.f32.mrf.mxu3 }
  0xb6   :  { %v371_v37 = vadd.f32 %v1106_v35, %v370_v34 }
  0xb7   :  { %757 = vmatpush.bf16.msrb.mxu0 %v1086_v26 }
  0xb8   :  { %v375_v40 = vmax.f32 %v371_v37, 0.0 }
  0xbb   :  { %758 = vmatpush.bf16.msrb.mxu0 %v1085_v27 }
  0xbd   :  { %v372_v39 = vpop.f32.mrf.mxu3 }
  0xbe   :  { %v373_v41 = vadd.f32 %v1106_v35, %v372_v39  ;;  %v1111_v35 = vld [vmem:[#allocation11 + $0x1] ss:$0 sm:$0xff] }
  0xbf   :  { %759 = vmatpush.bf16.msrb.mxu0 %v1084_v28 }
  0xc0   :  { %v376_v43 = vmax.f32 %v373_v41, 0.0 }
  0xc2   :  { %v377_v45 = vpack.c.bf16 %v376_v43, %v375_v40  ;;  %v1112_v40 = vld [vmem:[%s1429_s4 + $0x2] ss:$0 sm:$0xff] }
  0xc3   :  { %760 = vmatpush.bf16.msrb.mxu0 %v1083_v29 }
  0xc4   :  { %456 = vmatmul.bf16.vlgmr.msra.gmra.mxu0 %v377_v45  ;;  %971 = vmatmul.msk.bf16.vlgmr.msrb.gmra.mxu1 %vm144_vm0, %v1073_v44 }
 0x131   :  { %v242_v62 = vpop.f32.mrf.mxu1 }
 0x132   :  { %v243_v0 = vadd.f32 %v1107_v63, %v242_v62 }
 0x134   :  { %v247_v3 = vmax.f32 %v243_v0, 0.0 }
 0x139   :  { %v244_v1 = vpop.f32.mrf.mxu1 }
 0x13a   :  { %v245_v2 = vadd.f32 %v1107_v63, %v244_v1 }
 0x13c   :  { %v248_v4 = vmax.f32 %v245_v2, 0.0 }
 0x13e   :  { %v249_v5 = vpack.c.bf16 %v248_v4, %v247_v3 }
 0x140   :  { %326 = vmatmul.bf16.vlgmr.msra.gmra.mxu2 %v249_v5 }
 0x141   :  { %v457_v6 = vpop.f32.mrf.mxu0  ;;  %v588_v7 = vpop.f32.mrf.mxu1 }
 0x142   :  { %v458_v10 = vadd.f32 %v1108_v8, %v457_v6  ;;  %v589_v11 = vadd.f32 %v1109_v9, %v588_v7 }
 0x144   :  { %v462_v14 = vmax.f32 %v458_v10, 0.0  ;;  %v593_v17 = vmax.f32 %v589_v11, 0.0 }
 0x149   :  { %v459_v12 = vpop.f32.mrf.mxu0  ;;  %v590_v13 = vpop.f32.mrf.mxu1 }
 0x14a   :  { %v460_v15 = vadd.f32 %v1108_v8, %v459_v12  ;;  %v591_v16 = vadd.f32 %v1109_v9, %v590_v13 }
 0x14c   :  { %v463_v18 = vmax.f32 %v460_v15, 0.0  ;;  %v594_v19 = vmax.f32 %v591_v16, 0.0 }
 0x14e   :  { %v464_v20 = vpack.c.bf16 %v463_v18, %v462_v14  ;;  %v595_v21 = vpack.c.bf16 %v594_v19, %v593_v17 }
 0x150   :  { %543 = vmatmul.bf16.vlgmr.msra.gmra.mxu3 %v464_v20  ;;  %674 = vmatmul.bf16.vlgmr.msrb.gmra.mxu2 %v595_v21 }
 0x1c3   :  { %v327_v31 = vpop.f32.mrf.mxu2 }
 0x1c4   :  { %v328_v32 = vadd.f32 %v1110_v30, %v327_v31 }
 0x1c6   :  { %332 = vst [vmem:[#allocation13] sm:$0xff] %v328_v32 }
 0x1cb   :  { %v329_v33 = vpop.f32.mrf.mxu2 }
 0x1cc   :  { %v330_v34 = vadd.f32 %v1110_v30, %v329_v33 }
 0x1ce   :  { %333 = vst [vmem:[#allocation13 + $0x8] sm:$0xff] %v330_v34 }
 0x1d3   :  { %v544_v36 = vpop.f32.mrf.mxu3  ;;  %v675_v37 = vpop.f32.mrf.mxu2 }
 0x1d4   :  { %v545_v38 = vadd.f32 %v1111_v35, %v544_v36  ;;  %v676_v41 = vadd.f32 %v1112_v40, %v675_v37 }
 0x1d6   :  { %550 = vst [vmem:[#allocation13 + $0x10] sm:$0xff] %v545_v38  ;;  %v552_v39 = vadd.f32 %v545_v38, %v328_v32  ;;  %v680_v46 = vmax.f32 %v676_v41, 0.0 }
 0x1db   :  { %v546_v42 = vpop.f32.mrf.mxu3  ;;  %v677_v43 = vpop.f32.mrf.mxu2 }
 0x1dc   :  { %v547_v44 = vadd.f32 %v1111_v35, %v546_v42  ;;  %v678_v45 = vadd.f32 %v1112_v40, %v677_v43 }
 0x1de   :  { %551 = vst [vmem:[#allocation13 + $0x18] sm:$0xff] %v547_v44  ;;  %v553_v47 = vadd.f32 %v547_v44, %v330_v34  ;;  %v681_v48 = vmax.f32 %v678_v45, 0.0 }
 0x1e0   :  { %v682_v49 = vpack.c.bf16 %v681_v48, %v680_v46 }
 0x1e2   :  { %761 = vmatmul.bf16.vlgmr.msrb.gmra.mxu0 %v682_v49 }
 0x25f   :  { %v762_v51 = vpop.f32.mrf.mxu0 }
 0x260   :  { %v763_v52 = vadd.f32 %v1113_v50, %v762_v51 }
 0x262   :  { %768 = vst [vmem:[#allocation13 + $0x20] sm:$0xff] %v763_v52  ;;  %v770_v53 = vadd.f32 %v763_v52, %v552_v39 }
 0x264   :  { %v772_v54 = vmul.f32 0.33333334, %v770_v53 }
 0x266   :  { %774 = vst [vmem:[#allocation14] sm:$0xff] %v772_v54 }
 0x267   :  { %v764_v55 = vpop.f32.mrf.mxu0 }
 0x268   :  { %v765_v56 = vadd.f32 %v1113_v50, %v764_v55 }
 0x26a   :  { %769 = vst [vmem:[#allocation13 + $0x28] sm:$0xff] %v765_v56  ;;  %v771_v57 = vadd.f32 %v765_v56, %v553_v47 }
 0x26b   :  { %788 = dma.vmem_to_hbm [thread:$0]  %s781_s18, 768, %s783_s3, [#allocation4], %s1330_s0, %s1330_s0, %s1331_s24  }
 0x26c   :  { %v773_v58 = vmul.f32 0.33333334, %v771_v57 }
 0x26e   :  { %775 = vst [vmem:[#allocation14 + $0x8] sm:$0xff] %v773_v58 }
 0x26f   :  { %801 = dma.vmem_to_hbm [thread:$0]  %s794_s20, 256, %s796_s23, [#allocation15], %s1330_s0, %s1330_s0, %s1331_s24  }
 0x270   :  { %1314 = dma.done.wait [#allocation4], 768  }
 0x271   :  { %1315 = vsyncadd [#allocation4], 4294966528 }
 0x272   :  { %1316 = dma.done.wait [#allocation15], 256  }
 0x273   :  { %1317 = vsyncadd [#allocation15], 4294967040 }
 0x274   :  { %810 = vsyncpa [#allocation3], 1 }
 0x275   :  { %811 = vsyncpa [#allocation6], 1 }
 0x276   :  { %812 = vsyncpa [#allocation9], 1 }
 0x277   :  { %813 = vsyncpa [#allocation12], 1 }
 0x278   :  { %814 = vsyncpa [#allocation4], 1 }
 0x279   :  { %815 = vsyncpa [#allocation15], 1 }

</bundles_post_ra>
